<compile_context>
chip_gen: v6e
topology: v6e:2x2x1
jax: 0.10.0
libtpu: 0.0.40
codegen_flags: <defaults>
</compile_context>

<pallas_src>
import jax
import jax.numpy as jnp
from jax.experimental import pallas as pl
from jax.experimental.pallas import tpu as pltpu


_LANE = 128      # last-dim tiling unit (vreg lane width)
_SUBLANE = 8     # second-to-last-dim tiling unit


def _round_up(x, m):
    return (x + m - 1) // m * m


def _mlp_kernel(x_ref, w1_ref, b1_ref, w2_ref, b2_ref, out_ref):
    # y = relu(x @ W1 + b1) @ W2 + b2 : two MXU dots + VPU bias-adds / relu.
    h = jnp.dot(x_ref[...], w1_ref[...], preferred_element_type=jnp.float32)
    h = jnp.maximum(h + b1_ref[...], 0.0)
    y = jnp.dot(h, w2_ref[...], preferred_element_type=jnp.float32)
    out_ref[...] = (y + b2_ref[...]).astype(out_ref.dtype)


def pack_params(w1, b1, w2, b2, dtype=jnp.float32):
    """Pack PyTorch-layout nn.Linear params for the kernel.

    Inputs use torch layout: w1 (H, I), b1 (H,), w2 (O, H), b2 (O,).
    Returns (w1p (I, Hp), b1p (1, Hp), w2p (Hp, Op), b2p (1, Op)) with H and O
    zero-padded to multiples of 128 so both matmuls and the output store are
    lane-dense.  Call once per optimizer update, NOT per forward -- the result
    should be cached and reused across forward calls.
    """
    H, I = w1.shape
    O = w2.shape[0]
    Hp = _round_up(H, _LANE)
    Op = _round_up(O, _LANE)
    w1p = jnp.zeros((I, Hp), dtype).at[:, :H].set(w1.T.astype(dtype))
    b1p = jnp.zeros((1, Hp), dtype).at[0, :H].set(b1.astype(dtype))
    w2p = jnp.zeros((Hp, Op), dtype).at[:H, :O].set(w2.T.astype(dtype))
    b2p = jnp.zeros((1, Op), dtype).at[0, :O].set(b2.astype(dtype))
    return w1p, b1p, w2p, b2p


def linear_qnet_forward(x, w1p, b1p, w2p, b2p, *, output_size, block_b=4096):
    """Fused relu(x @ W1 + b1) @ W2 + b2 on packed params.

    x: (B, I) f32; packed params from pack_params().  `output_size` is the
    logical O (the padded lanes are sliced off here, under the same jit as
    any consumer so the slice fuses).
    """
    B, I = x.shape
    Hp = w1p.shape[1]
    Op = w2p.shape[1]
    dtype = x.dtype

    # Validate / round the batch tile so (tb, *) block shapes never violate
    # the sublane constraint.
    block_b = _round_up(max(int(block_b), _SUBLANE), _SUBLANE)

    if B <= block_b:
        # Single tile: gridless call, no index_map / pipeline bookkeeping,
        # every operand resident in VMEM, lane-dense (Bp, 128) output store.
        Bp = _round_up(B, _SUBLANE)
        xp = x if Bp == B else jnp.pad(x, ((0, Bp - B), (0, 0)))
        y = pl.pallas_call(
            _mlp_kernel,
            out_shape=jax.ShapeDtypeStruct((Bp, Op), dtype),
            in_specs=[pl.BlockSpec(memory_space=pltpu.MemorySpace.VMEM)] * 5,
            out_specs=pl.BlockSpec(memory_space=pltpu.MemorySpace.VMEM),
        )(xp, w1p, b1p, w2p, b2p)
    else:
        # Huge batch: tile over B, keep the (tiny) weights resident (constant
        # index_map), overlap x/out DMA of tile i+1 with the matmuls of tile
        # i.  "parallel" lets v7x shard tiles across both TensorCores.
        tb = block_b
        Bp = _round_up(B, tb)
        xp = x if Bp == B else jnp.pad(x, ((0, Bp - B), (0, 0)))
        grid = (Bp // tb,)

        # Rough per-call VMEM footprint: double-buffered x/out tiles plus
        # double-buffered (tiny) weights/biases.  Only raise the scoped-VMEM
        # limit when we would exceed v5e's 16 MiB default.
        vmem_est = 2 * 4 * (tb * I + tb * Op) + 2 * 4 * (I * Hp + Hp + Hp * Op + Op)
        cp_kwargs = dict(dimension_semantics=("parallel",))
        if vmem_est > 12 * 1024 * 1024:
            cp_kwargs["vmem_limit_bytes"] = min(2 * vmem_est, 100 * 1024 * 1024)

        y = pl.pallas_call(
            _mlp_kernel,
            out_shape=jax.ShapeDtypeStruct((Bp, Op), dtype),
            grid=grid,
            in_specs=[
                pl.BlockSpec((tb, I), lambda i: (i, 0)),
                pl.BlockSpec((I, Hp), lambda i: (0, 0)),
                pl.BlockSpec((1, Hp), lambda i: (0, 0)),
                pl.BlockSpec((Hp, Op), lambda i: (0, 0)),
                pl.BlockSpec((1, Op), lambda i: (0, 0)),
            ],
            out_specs=pl.BlockSpec((tb, Op), lambda i: (i, 0)),
            compiler_params=pltpu.CompilerParams(**cp_kwargs),
        )(xp, w1p, b1p, w2p, b2p)

    # Slice off batch / lane padding; fuses with the consumer under jit.
    return y[:B, :output_size]


def _reference_forward(x, w1, b1, w2, b2):
    # PyTorch layout: w (out, in); y = relu(x @ w1.T + b1) @ w2.T + b2.
    h = jnp.maximum(x @ w1.T + b1, 0.0)
    return h @ w2.T + b2


if __name__ == "__main__":
    # Shapes consistent with LinearQNet(input_size, hidden_size, output_size).
    batch, input_size, hidden_size, output_size = 8, 16, 32, 4

    key = jax.random.PRNGKey(0)
    kx, kw1, kb1, kw2, kb2, kx2 = jax.random.split(key, 6)

    # PyTorch-style uniform(-1/sqrt(fan_in), 1/sqrt(fan_in)) init, torch layout.
    bound1 = 1.0 / jnp.sqrt(jnp.float32(input_size))
    bound2 = 1.0 / jnp.sqrt(jnp.float32(hidden_size))
    w1 = jax.random.uniform(kw1, (hidden_size, input_size),
                            minval=-bound1, maxval=bound1, dtype=jnp.float32)
    b1 = jax.random.uniform(kb1, (hidden_size,),
                            minval=-bound1, maxval=bound1, dtype=jnp.float32)
    w2 = jax.random.uniform(kw2, (output_size, hidden_size),
                            minval=-bound2, maxval=bound2, dtype=jnp.float32)
    b2 = jax.random.uniform(kb2, (output_size,),
                            minval=-bound2, maxval=bound2, dtype=jnp.float32)

    # Pack ONCE (would be re-done only after each optimizer step).
    packed = pack_params(w1, b1, w2, b2)

    # Jit the forward at the call site (eager dispatch of the pallas_call +
    # slice costs more than the kernel itself).
    fwd = jax.jit(linear_qnet_forward, static_argnames=("output_size", "block_b"))

    # --- small (single-state inference) path: gridless kernel ---
    x = jax.random.normal(kx, (batch, input_size), dtype=jnp.float32)
    out = jax.block_until_ready(fwd(x, *packed, output_size=output_size))
    ref = _reference_forward(x, w1, b1, w2, b2)
    assert out.shape == (batch, output_size)
    assert jnp.allclose(out, ref, atol=1e-5, rtol=1e-5)

    # --- large (replay-batch training) path: batch-tiled parallel grid ---
    # (block_b lowered here only to exercise the grid path at test size.)
    xb = jax.random.normal(kx2, (1024, input_size), dtype=jnp.float32)
    outb = jax.block_until_ready(
        fwd(xb, *packed, output_size=output_size, block_b=256))
    refb = _reference_forward(xb, w1, b1, w2, b2)
    assert outb.shape == (1024, output_size)
    assert jnp.allclose(outb, refb, atol=1e-5, rtol=1e-5)

    print("KERNEL_OK")
</pallas_src>

<mosaic_0001>
module attributes {stable_mosaic.version = 11 : i64} {
  func.func @_mlp_kernel(%arg0: memref<8x16xf32, #tpu.memory_space<vmem>>, %arg1: memref<16x128xf32, #tpu.memory_space<vmem>>, %arg2: memref<1x128xf32, #tpu.memory_space<vmem>>, %arg3: memref<128x128xf32, #tpu.memory_space<vmem>>, %arg4: memref<1x128xf32, #tpu.memory_space<vmem>>, %arg5: memref<8x128xf32, #tpu.memory_space<vmem>>) attributes {dimension_semantics = [], scalar_prefetch = 0 : i64, scratch_operands = 0 : i64, tpu.core_type = #tpu.core_type<tc>} {
    %c0 = arith.constant 0 : index
    %c0_0 = arith.constant 0 : index
    %0 = vector.load %arg0[%c0, %c0_0] : memref<8x16xf32, #tpu.memory_space<vmem>>, vector<8x16xf32>
    %c0_1 = arith.constant 0 : index
    %c0_2 = arith.constant 0 : index
    %1 = vector.load %arg1[%c0_1, %c0_2] : memref<16x128xf32, #tpu.memory_space<vmem>>, vector<16x128xf32>
    %cst = arith.constant dense<0.000000e+00> : vector<8x128xf32>
    %2 = tpu.matmul %0, %1, %cst {dimension_numbers = #tpu.dot_dimension_numbers<[1], [0], [0], [1], [0, 0, 1, 1], [], []>} : vector<8x16xf32>, vector<16x128xf32>, vector<8x128xf32> -> vector<8x128xf32>
    %c0_3 = arith.constant 0 : index
    %c0_4 = arith.constant 0 : index
    %3 = vector.load %arg2[%c0_3, %c0_4] : memref<1x128xf32, #tpu.memory_space<vmem>>, vector<1x128xf32>
    %4 = vector.broadcast %3 : vector<1x128xf32> to vector<8x128xf32>
    %5 = arith.addf %2, %4 : vector<8x128xf32>
    %cst_5 = arith.constant 0.000000e+00 : f32
    %6 = vector.broadcast %cst_5 : f32 to vector<8x128xf32>
    %7 = arith.maximumf %5, %6 : vector<8x128xf32>
    %c0_6 = arith.constant 0 : index
    %c0_7 = arith.constant 0 : index
    %8 = vector.load %arg3[%c0_6, %c0_7] : memref<128x128xf32, #tpu.memory_space<vmem>>, vector<128x128xf32>
    %cst_8 = arith.constant dense<0.000000e+00> : vector<8x128xf32>
    %9 = tpu.matmul %7, %8, %cst_8 {dimension_numbers = #tpu.dot_dimension_numbers<[1], [0], [0], [1], [0, 0, 1, 1], [], []>} : vector<8x128xf32>, vector<128x128xf32>, vector<8x128xf32> -> vector<8x128xf32>
    %c0_9 = arith.constant 0 : index
    %c0_10 = arith.constant 0 : index
    %10 = vector.load %arg4[%c0_9, %c0_10] : memref<1x128xf32, #tpu.memory_space<vmem>>, vector<1x128xf32>
    %11 = vector.broadcast %10 : vector<1x128xf32> to vector<8x128xf32>
    %12 = arith.addf %9, %11 : vector<8x128xf32>
    %c0_11 = arith.constant 0 : index
    %c0_12 = arith.constant 0 : index
    %13 = vector.load %arg5[%c0_11, %c0_12] : memref<8x128xf32, #tpu.memory_space<vmem>>, vector<8x128xf32>
    tpu.vector_store %arg5[%c0_11, %c0_12], %12 {strides = array<i32>} : memref<8x128xf32, #tpu.memory_space<vmem>>, vector<8x128xf32>,
    return
  }
}

</mosaic_0001>

<bundles_post_ra>
// kernel: linear_qnet_forward.1
= control target key start
LH: loop header
LB: loop body
LE: loop exit
PB: predicated region body
PF: predicated region fallthrough
CT: control target
= control target key end

     0   :  { %10 = vsyncpa [#allocation3], 0  ;;  %s435_s0 = inlined_call_operand.hbm [shape: f32[8,16], index: 0, kind: input, shape index: {}]   ;;  %s436_s1 = inlined_call_operand.hbm [shape: f32[16,128], index: 1, kind: input, shape index: {}]   ;;  %s437_s2 = inlined_call_operand.vmem [shape: f32[1,128], index: 2, kind: input, shape index: {}]   ;;  %s438_s3 = inlined_call_operand.hbm [shape: f32[128,128], index: 3, kind: input, shape index: {}]   ;;  %s439_s4 = inlined_call_operand.vmem [shape: f32[1,128], index: 4, kind: input, shape index: {}]   ;;  %s440_s5 = inlined_call_operand.vmem [shape: f32[8,128], index: 5, kind: output, shape index: {}]  }
   0x1   :  { %11 = vsyncpa [#allocation5], 0  ;;  %s380_s18 = smov [#allocation4]  }
   0x2   :  { %s27_s19 = sshll.u32 %s380_s18, 4  ;;  %s28_s19 = int_to_ptr.vmem [resolvable:$true] %s27_s19 }
   0x3   :  { %s324_s20 = scalar_lea.vmem %s28_s19, 256  ;;  %p329_p1 = scmp.lt.s32.totalorder %s28_s19, %s28_s19 }
   0x4   :  { %p325_p0 = scmp.ne.s32.totalorder %s28_s19, %s324_s20  ;;  %p330_p2 = scmp.lt.s32.totalorder %s324_s20, %s324_s20 }
   0x6   :  { %p331_p3 = por %p330_p2, %p329_p1 }
   0x8   :  { %p332_p4 = pnand %p331_p3, %p325_p0 }
   0xa   :  { %335 = shalt.err (!%p332_p4)
}
   0xb   :  { %s381_s21 = smov 128   ;;  %s382_s22 = smov 8  }
   0xc   :  { %33 = dma.hbm_to_vmem [thread:$0]  %s436_s1, 256, %s28_s19, [#allocation5], %s381_s21, %s381_s21, %s382_s22  }
   0xd   :  { %s383_s25 = smov [#allocation2]   ;;  %s384_s27 = smov [#allocation6]  }
   0xe   :  { %s18_s26 = sshll.u32 %s383_s25, 4  ;;  %s41_s28 = sshll.u32 %s384_s27, 4  ;;  %s19_s26 = int_to_ptr.vmem [resolvable:$true] %s18_s26  ;;  %s42_s28 = int_to_ptr.vmem [resolvable:$true] %s41_s28 }
   0xf   :  { %s344_s29 = scalar_lea.vmem %s19_s26, 128  ;;  %p349_p6 = scmp.lt.s32.totalorder %s19_s26, %s19_s26 }
  0x10   :  { %p345_p5 = scmp.ne.s32.totalorder %s19_s26, %s344_s29  ;;  %p350_p7 = scmp.lt.s32.totalorder %s344_s29, %s344_s29 }
  0x12   :  { %p351_p8 = por %p350_p7, %p349_p6 }
  0x14   :  { %p352_p9 = pnand %p351_p8, %p345_p5 }
  0x16   :  { %355 = shalt.err (!%p352_p9)
}
  0x17   :  { %21 = dma.hbm_to_vmem [thread:$0]  %s435_s0, 128, %s19_s26, [#allocation3]  }
  0x18   :  { %s364_s7 = scalar_lea.vmem %s42_s28, 2048  ;;  %p369_p11 = scmp.lt.s32.totalorder %s42_s28, %s42_s28 }
  0x19   :  { %p365_p10 = scmp.ne.s32.totalorder %s42_s28, %s364_s7  ;;  %p370_p12 = scmp.lt.s32.totalorder %s364_s7, %s364_s7 }
  0x1b   :  { %p371_p13 = por %p370_p12, %p369_p11 }
  0x1d   :  { %p372_p0 = pnand %p371_p13, %p365_p10 }
  0x1f   :  { %375 = shalt.err (!%p372_p0)
}
  0x20   :  { %47 = dma.hbm_to_vmem [thread:$0]  %s438_s3, 2048, %s42_s28, [#allocation5], %s381_s21, %s381_s21, %s382_s22  }
  0x21   :  { %376 = dma.done.wait [#allocation3], 128  }
  0x22   :  { %377 = vsyncadd [#allocation3], 4294967168 }
  0x23   :  { %378 = dma.done.wait [#allocation5], 2304  }
  0x24   :  { %379 = vsyncadd [#allocation5], 4294964992  ;;  %v385_v0 = vmov 0.0   ;;  %vm386_vm0 = vmmov 0   ;;  %v61_v1 = vld [vmem:[#allocation4 + $0x8] sm:$0xff]  ;;  %v60_v2 = vld [vmem:[#allocation4] sm:$0xff] }
  0x25   :  { %267 = vmatprep.subr.mxu0 %v385_v0  ;;  %271 = vmatprep.mubr.msk.f32.mxu0 %vm386_vm0, %v385_v0  ;;  %v59_v3 = vld [vmem:[#allocation2] sm:$0xff]  ;;  %vm69_vm1 = vcmask 130048   ;;  %v159_v4 = vld [vmem:[#allocation6 + $0x78] sm:$0xff]  ;;  %v158_v5 = vld [vmem:[#allocation6 + $0x70] sm:$0xff] }
  0x26   :  { %274 = vmatprep.subr.mxu1 %v385_v0  ;;  %306 = vmatprep.mubr.msk.f32.mxu1 %vm386_vm0, %v385_v0  ;;  %v157_v6 = vld [vmem:[#allocation6 + $0x68] sm:$0xff]  ;;  %v156_v7 = vld [vmem:[#allocation6 + $0x60] sm:$0xff]  ;;  %v155_v8 = vld [vmem:[#allocation6 + $0x58] sm:$0xff] }
  0x27   :  { %268 = vmatpush3.msra.mxu0 %v61_v1  ;;  %275 = vmatpush3.msra.mxu1 %v159_v4  ;;  %v154_v9 = vld [vmem:[#allocation6 + $0x50] sm:$0xff]  ;;  %v153_v10 = vld [vmem:[#allocation6 + $0x48] sm:$0xff]  ;;  %v152_v11 = vld [vmem:[#allocation6 + $0x40] sm:$0xff] }
  0x28   :  { %269 = vmatprep.subr.mxu0 %v385_v0  ;;  %276 = vmatprep.subr.mxu1 %v385_v0  ;;  %v151_v12 = vld [vmem:[#allocation6 + $0x38] sm:$0xff]  ;;  %v150_v13 = vld [vmem:[#allocation6 + $0x30] sm:$0xff]  ;;  %v149_v14 = vld [vmem:[#allocation6 + $0x28] sm:$0xff] }
  0x29   :  { %270 = vmatpush3.msra.mxu0 %v60_v2  ;;  %277 = vmatpush3.msra.mxu1 %v158_v5  ;;  %v148_v15 = vld [vmem:[#allocation6 + $0x20] sm:$0xff]  ;;  %v147_v16 = vld [vmem:[#allocation6 + $0x18] sm:$0xff]  ;;  %v146_v17 = vld [vmem:[#allocation6 + $0x10] sm:$0xff] }
  0x2a   :  { %272 = vmatmul.mubr.msk.f32.vlgmr.msra.gmra.mxu0 %vm69_vm1, %v59_v3  ;;  %278 = vmatprep.subr.mxu1 %v385_v0  ;;  %v145_v18 = vld [vmem:[#allocation6 + $0x8] sm:$0xff]  ;;  %v144_v19 = vld [vmem:[#allocation6] sm:$0xff] }
  0x2b   :  { %279 = vmatpush3.msra.mxu1 %v157_v6  ;;  %v244_v20 = vld [vmem:[%s437_s2] ss:$0 sm:$0xff] }
  0x2c   :  { %280 = vmatprep.subr.mxu1 %v385_v0  ;;  %v246_v25 = vld [vmem:[%s439_s4] ss:$0 sm:$0xff] }
  0x2d   :  { %281 = vmatpush3.msra.mxu1 %v156_v7 }
  0x2e   :  { %282 = vmatprep.subr.mxu1 %v385_v0 }
  0x2f   :  { %283 = vmatpush3.msra.mxu1 %v155_v8 }
  0x30   :  { %284 = vmatprep.subr.mxu1 %v385_v0 }
  0x31   :  { %285 = vmatpush3.msra.mxu1 %v154_v9 }
  0x32   :  { %286 = vmatprep.subr.mxu1 %v385_v0 }
  0x33   :  { %287 = vmatpush3.msra.mxu1 %v153_v10 }
  0x34   :  { %288 = vmatprep.subr.mxu1 %v385_v0 }
  0x35   :  { %289 = vmatpush3.msra.mxu1 %v152_v11 }
  0x36   :  { %290 = vmatprep.subr.mxu1 %v385_v0 }
  0x37   :  { %291 = vmatpush3.msra.mxu1 %v151_v12 }
  0x38   :  { %292 = vmatprep.subr.mxu1 %v385_v0 }
  0x39   :  { %293 = vmatpush3.msra.mxu1 %v150_v13 }
  0x3a   :  { %294 = vmatprep.subr.mxu1 %v385_v0 }
  0x3b   :  { %295 = vmatpush3.msra.mxu1 %v149_v14 }
  0x3c   :  { %296 = vmatprep.subr.mxu1 %v385_v0 }
  0x3d   :  { %297 = vmatpush3.msra.mxu1 %v148_v15 }
  0x3e   :  { %298 = vmatprep.subr.mxu1 %v385_v0 }
  0x3f   :  { %299 = vmatpush3.msra.mxu1 %v147_v16 }
  0x40   :  { %300 = vmatprep.subr.mxu1 %v385_v0 }
  0x41   :  { %301 = vmatpush3.msra.mxu1 %v146_v17 }
  0x42   :  { %302 = vmatprep.subr.mxu1 %v385_v0 }
  0x43   :  { %303 = vmatpush3.msra.mxu1 %v145_v18 }
  0x44   :  { %304 = vmatprep.subr.mxu1 %v385_v0 }
  0x45   :  { %305 = vmatpush3.msra.mxu1 %v144_v19 }
  0xea   :  { %v139_v21 = vpop.f32.mrf.mxu0 }
  0xeb   :  { %v140_v22 = vadd.f32 %v244_v20, %v139_v21 }
  0xec   :  { %v273_v23 = vpop.f32.mrf.mxu0 }
  0xed   :  { %v143_v24 = vmax.f32 %v140_v22, 0.0 }
  0xef   :  { %307 = vmatmul.mubr.f32.vlgmr.msra.gmra.mxu1 %v143_v24 }
 0x1af   :  { %v233_v26 = vpop.f32.mrf.mxu1 }
 0x1b0   :  { %v234_v27 = vadd.f32 %v246_v25, %v233_v26 }
 0x1b1   :  { %v308_v28 = vpop.f32.mrf.mxu1 }
 0x1b2   :  { %237 = vst [vmem:[%s440_s5] sm:$0xff] %v234_v27 }
 0x1b3   :  { %242 = vsyncpa [#allocation3], 1 }
 0x1b4   :  { %243 = vsyncpa [#allocation5], 1 }

</bundles_post_ra>
